<compile_context>
chip_gen: v7x
topology: tpu7x:2x2x1
jax: 0.10.0
libtpu: 0.0.40
codegen_flags: <defaults>
</compile_context>

<pallas_src>
import jax
import jax.numpy as jnp
from jax.experimental import pallas as pl
from jax.experimental.pallas import tpu as pltpu

_LANE = 128


def _round_up(n, m):
    return pl.cdiv(n, m) * m


# ----------------------------------------------------------------------------
# Pallas kernel: per-mode complex channel contraction, modes on the lane axis
# ----------------------------------------------------------------------------
def _complex_mode_contract_kernel(x_ref, w_ref, o_ref):
    # x_ref: (2, B, Cin, TM)   [real, imag] stacked on axis 0
    # w_ref: (2, Cin, Cout, TM)
    # o_ref: (2, B, Cout, TM)
    xr = x_ref[0]                         # (B, Cin, TM)
    xi = x_ref[1]
    wr = w_ref[0]                         # (Cin, Cout, TM)
    wi = w_ref[1]

    B, Cin, TM = xr.shape
    Cout = wr.shape[1]

    # Hoisted sums for Gauss's 3-multiply complex product.
    xs = xr + xi                          # (B, Cin, TM)
    ws = wr + wi                          # (Cin, Cout, TM)

    rr = jnp.zeros((B, Cout, TM), jnp.float32)
    ii = jnp.zeros((B, Cout, TM), jnp.float32)
    kk = jnp.zeros((B, Cout, TM), jnp.float32)

    # Static (small) Cin loop of broadcast multiply-adds over the 128-lane mode
    # axis -- pure VPU work that hides under the HBM stream.
    for i in range(Cin):
        xri = xr[:, i:i + 1, :]           # (B, 1, TM)
        xii = xi[:, i:i + 1, :]
        xsi = xs[:, i:i + 1, :]
        wri = wr[i][None]                 # (1, Cout, TM)
        wii = wi[i][None]
        wsi = ws[i][None]
        rr = rr + xri * wri
        ii = ii + xii * wii
        kk = kk + xsi * wsi

    # (xr + i xi) * (wr + i wi)
    o_ref[0] = rr - ii                    # real part
    o_ref[1] = kk - rr - ii               # imag part


def _pick_tile_m(Mp, B, Cin, Cout, budget_bytes=16 << 20):
    """Largest mode tile (multiple of 128, dividing Mp) fitting the VMEM budget."""
    # f32 bytes per retained-mode lane across x (2,B,Cin), w (2,Cin,Cout),
    # out (2,B,Cout); double-buffering headroom comes from the modest budget.
    bytes_per_lane = 4 * (2 * B * Cin + 2 * Cin * Cout + 2 * B * Cout)
    max_lanes = max(_LANE, budget_bytes // max(bytes_per_lane, 1))
    max_lanes = (max_lanes // _LANE) * _LANE
    if max_lanes >= Mp:
        return Mp
    # Largest multiple of 128 <= max_lanes that divides Mp (128 always works).
    t = max_lanes
    while t > _LANE and Mp % t != 0:
        t -= _LANE
    return t


def complex_mode_contract(x_ri, w_ri):
    """x_ri (2,B,Cin,Mp) f32, w_ri (2,Cin,Cout,Mp) f32 -> (2,B,Cout,Mp) f32.

    Contracts over Cin independently for every (already lane-padded) mode m:
        out[b,o,m] = sum_i (xr+ixi)[b,i,m] * (wr+iwi)[i,o,m]
    with real/imag stacked on the leading axis.  Mp must be a multiple of 128.
    """
    _, B, Cin, Mp = x_ri.shape
    _, _, Cout, Mpw = w_ri.shape
    assert Mp == Mpw and Mp % _LANE == 0

    tile_m = _pick_tile_m(Mp, B, Cin, Cout)

    return pl.pallas_call(
        _complex_mode_contract_kernel,
        out_shape=jax.ShapeDtypeStruct((2, B, Cout, Mp), jnp.float32),
        grid_spec=pltpu.PrefetchScalarGridSpec(
            num_scalar_prefetch=0,
            grid=(Mp // tile_m,),
            in_specs=[
                pl.BlockSpec((2, B, Cin, tile_m), lambda m: (0, 0, 0, m)),
                pl.BlockSpec((2, Cin, Cout, tile_m), lambda m: (0, 0, 0, m)),
            ],
            out_specs=pl.BlockSpec((2, B, Cout, tile_m), lambda m: (0, 0, 0, m)),
        ),
        compiler_params=pltpu.CompilerParams(
            dimension_semantics=("parallel",),
            vmem_limit_bytes=48 << 20,
        ),
    )(x_ri, w_ri)


# ----------------------------------------------------------------------------
# SpectralConv2d module (JAX/Pallas)
# ----------------------------------------------------------------------------
class SpectralConv2d:
    def __init__(self, in_channels, out_channels, modes1, modes2, key):
        self.in_channels = in_channels
        self.out_channels = out_channels
        self.modes1 = modes1
        self.modes2 = modes2
        scale = 1.0 / (in_channels * out_channels)
        shape = (in_channels, out_channels, modes1, modes2)
        k1, k2, k3, k4 = jax.random.split(key, 4)
        # torch.rand on cfloat -> uniform [0,1) real and imaginary parts.
        self.weights1 = (scale * (jax.random.uniform(k1, shape, jnp.float32)
                                  + 1j * jax.random.uniform(k2, shape, jnp.float32))
                         ).astype(jnp.complex64)
        self.weights2 = (scale * (jax.random.uniform(k3, shape, jnp.float32)
                                  + 1j * jax.random.uniform(k4, shape, jnp.float32))
                         ).astype(jnp.complex64)

        # Kernel-friendly weight layout, hoisted out of the forward path:
        #   (Ci, Co, m1, m2) x2 --reshape+concat--> (Ci, Co, 2*m1*m2) complex
        #   --stack real/imag--> (2, Ci, Co, M) f32 --lane pad--> (2, Ci, Co, Mp)
        # Pure reshape / concat / pad: no transposes.
        M = 2 * modes1 * modes2
        Mp = _round_up(M, _LANE)
        w_modes = jnp.concatenate(
            [self.weights1.reshape(in_channels, out_channels, modes1 * modes2),
             self.weights2.reshape(in_channels, out_channels, modes1 * modes2)],
            axis=-1)                                             # (Ci, Co, M) complex
        w_ri = jnp.stack(
            [jnp.real(w_modes), jnp.imag(w_modes)], axis=0
        ).astype(jnp.float32)                                    # (2, Ci, Co, M)
        self.w_ri = jnp.pad(w_ri, ((0, 0), (0, 0), (0, 0), (0, Mp - M)))
        self._M = M
        self._Mp = Mp

    def __call__(self, x):
        B, Ci, H, W = x.shape
        Co, m1, m2 = self.out_channels, self.modes1, self.modes2
        M, Mp = self._M, self._Mp

        x_ft = jnp.fft.rfft2(x)                                  # (B, Ci, H, W//2+1)
        top = x_ft[:, :, :m1, :m2].reshape(B, Ci, m1 * m2)       # low +freq rows
        bot = x_ft[:, :, H - m1:, :m2].reshape(B, Ci, m1 * m2)   # low -freq rows
        x_modes = jnp.concatenate([top, bot], axis=-1)           # (B, Ci, M) complex
        x_ri = jnp.stack(
            [jnp.real(x_modes), jnp.imag(x_modes)], axis=0
        ).astype(jnp.float32)                                    # (2, B, Ci, M)
        x_ri = jnp.pad(x_ri, ((0, 0), (0, 0), (0, 0), (0, Mp - M)))

        out_ri = complex_mode_contract(x_ri, self.w_ri)          # (2, B, Co, Mp)
        out_c = (out_ri[0, :, :, :M]
                 + 1j * out_ri[1, :, :, :M])                     # (B, Co, M) complex64
        half = m1 * m2
        out_top = out_c[:, :, :half].reshape(B, Co, m1, m2)
        out_bot = out_c[:, :, half:].reshape(B, Co, m1, m2)

        out_ft = jnp.zeros((B, Co, H, W // 2 + 1), dtype=jnp.complex64)
        out_ft = out_ft.at[:, :, :m1, :m2].set(out_top)
        out_ft = out_ft.at[:, :, H - m1:, :m2].set(out_bot)

        return jnp.fft.irfft2(out_ft, s=(H, W))                  # (B, Co, H, W) f32


# ----------------------------------------------------------------------------
# Pure-JAX reference (mirrors the PyTorch forward) for a correctness check
# ----------------------------------------------------------------------------
def reference_forward(x, w1, w2, m1, m2):
    B, Ci, H, W = x.shape
    Co = w1.shape[1]
    x_ft = jnp.fft.rfft2(x)
    out_ft = jnp.zeros((B, Co, H, W // 2 + 1), dtype=jnp.complex64)
    out_ft = out_ft.at[:, :, :m1, :m2].set(
        jnp.einsum('bixy,ioxy->boxy', x_ft[:, :, :m1, :m2], w1))
    out_ft = out_ft.at[:, :, H - m1:, :m2].set(
        jnp.einsum('bixy,ioxy->boxy', x_ft[:, :, H - m1:, :m2], w2))
    return jnp.fft.irfft2(out_ft, s=(H, W))


if __name__ == "__main__":
    key = jax.random.PRNGKey(0)
    k_param, k_x = jax.random.split(key)

    B, C_in, C_out, H, W = 2, 4, 4, 16, 16
    modes1, modes2 = 6, 6                      # must satisfy modes2 <= W//2 + 1

    layer = SpectralConv2d(C_in, C_out, modes1, modes2, k_param)
    x = jax.random.normal(k_x, (B, C_in, H, W), dtype=jnp.float32)

    out = jax.jit(layer.__call__)(x)
    out = jax.block_until_ready(out)

    ref = reference_forward(x, layer.weights1, layer.weights2, modes1, modes2)
    ref = jax.block_until_ready(ref)

    assert out.shape == (B, C_out, H, W)
    assert out.dtype == jnp.float32
    assert jnp.allclose(out, ref, atol=1e-4, rtol=1e-4), "mismatch vs reference"

    print("KERNEL_OK")
</pallas_src>

<mosaic_0001>
module attributes {stable_mosaic.version = 11 : i64} {
  func.func @_complex_mode_contract_kernel(%arg0: i32, %arg1: memref<2x2x4x128xf32, #tpu.memory_space<vmem>>, %arg2: memref<2x4x4x128xf32, #tpu.memory_space<vmem>>, %arg3: memref<2x2x4x128xf32, #tpu.memory_space<vmem>>) attributes {dimension_semantics = [#tpu.dimension_semantics<parallel>], iteration_bounds = array<i64: 1>, scalar_prefetch = 0 : i64, scratch_operands = 0 : i64, tpu.core_type = #tpu.core_type<tc>, window_params = [{transform_indices = @transform_0, window_bounds = array<i64: 2, 2, 4, 128>}, {transform_indices = @transform_1, window_bounds = array<i64: 2, 4, 4, 128>}, {transform_indices = @transform_2, window_bounds = array<i64: 2, 2, 4, 128>}]} {
    %c0 = arith.constant 0 : index
    %c0_0 = arith.constant 0 : index
    %c0_1 = arith.constant 0 : index
    %c0_2 = arith.constant 0 : index
    %0 = vector.load %arg1[%c0, %c0_0, %c0_1, %c0_2] : memref<2x2x4x128xf32, #tpu.memory_space<vmem>>, vector<1x2x4x128xf32>
    %1 = vector.shape_cast %0 : vector<1x2x4x128xf32> to vector<2x4x128xf32>
    %c1 = arith.constant 1 : index
    %c0_3 = arith.constant 0 : index
    %c0_4 = arith.constant 0 : index
    %c0_5 = arith.constant 0 : index
    %2 = vector.load %arg1[%c1, %c0_3, %c0_4, %c0_5] : memref<2x2x4x128xf32, #tpu.memory_space<vmem>>, vector<1x2x4x128xf32>
    %3 = vector.shape_cast %2 : vector<1x2x4x128xf32> to vector<2x4x128xf32>
    %c0_6 = arith.constant 0 : index
    %c0_7 = arith.constant 0 : index
    %c0_8 = arith.constant 0 : index
    %c0_9 = arith.constant 0 : index
    %4 = vector.load %arg2[%c0_6, %c0_7, %c0_8, %c0_9] : memref<2x4x4x128xf32, #tpu.memory_space<vmem>>, vector<1x4x4x128xf32>
    %5 = vector.shape_cast %4 : vector<1x4x4x128xf32> to vector<4x4x128xf32>
    %c1_10 = arith.constant 1 : index
    %c0_11 = arith.constant 0 : index
    %c0_12 = arith.constant 0 : index
    %c0_13 = arith.constant 0 : index
    %6 = vector.load %arg2[%c1_10, %c0_11, %c0_12, %c0_13] : memref<2x4x4x128xf32, #tpu.memory_space<vmem>>, vector<1x4x4x128xf32>
    %7 = vector.shape_cast %6 : vector<1x4x4x128xf32> to vector<4x4x128xf32>
    %8 = arith.addf %1, %3 : vector<2x4x128xf32>
    %9 = arith.addf %5, %7 : vector<4x4x128xf32>
    %cst = arith.constant 0.000000e+00 : f32
    %10 = vector.broadcast %cst : f32 to vector<2x4x128xf32>
    %cst_14 = arith.constant 0.000000e+00 : f32
    %11 = vector.broadcast %cst_14 : f32 to vector<2x4x128xf32>
    %cst_15 = arith.constant 0.000000e+00 : f32
    %12 = vector.broadcast %cst_15 : f32 to vector<2x4x128xf32>
    %13 = vector.extract_strided_slice %1 {offsets = [0, 0, 0], sizes = [2, 1, 128], strides = [1, 1, 1]} : vector<2x4x128xf32> to vector<2x1x128xf32>
    %14 = vector.extract_strided_slice %3 {offsets = [0, 0, 0], sizes = [2, 1, 128], strides = [1, 1, 1]} : vector<2x4x128xf32> to vector<2x1x128xf32>
    %15 = vector.extract_strided_slice %8 {offsets = [0, 0, 0], sizes = [2, 1, 128], strides = [1, 1, 1]} : vector<2x4x128xf32> to vector<2x1x128xf32>
    %16 = vector.extract_strided_slice %5 {offsets = [0, 0, 0], sizes = [1, 4, 128], strides = [1, 1, 1]} : vector<4x4x128xf32> to vector<1x4x128xf32>
    %17 = vector.shape_cast %16 : vector<1x4x128xf32> to vector<4x128xf32>
    %18 = vector.shape_cast %17 : vector<4x128xf32> to vector<1x4x128xf32>
    %19 = vector.extract_strided_slice %7 {offsets = [0, 0, 0], sizes = [1, 4, 128], strides = [1, 1, 1]} : vector<4x4x128xf32> to vector<1x4x128xf32>
    %20 = vector.shape_cast %19 : vector<1x4x128xf32> to vector<4x128xf32>
    %21 = vector.shape_cast %20 : vector<4x128xf32> to vector<1x4x128xf32>
    %22 = vector.extract_strided_slice %9 {offsets = [0, 0, 0], sizes = [1, 4, 128], strides = [1, 1, 1]} : vector<4x4x128xf32> to vector<1x4x128xf32>
    %23 = vector.shape_cast %22 : vector<1x4x128xf32> to vector<4x128xf32>
    %24 = vector.shape_cast %23 : vector<4x128xf32> to vector<1x4x128xf32>
    %25 = vector.broadcast %13 : vector<2x1x128xf32> to vector<2x4x128xf32>
    %26 = vector.broadcast %18 : vector<1x4x128xf32> to vector<2x4x128xf32>
    %27 = arith.mulf %25, %26 : vector<2x4x128xf32>
    %28 = arith.addf %10, %27 : vector<2x4x128xf32>
    %29 = vector.broadcast %14 : vector<2x1x128xf32> to vector<2x4x128xf32>
    %30 = vector.broadcast %21 : vector<1x4x128xf32> to vector<2x4x128xf32>
    %31 = arith.mulf %29, %30 : vector<2x4x128xf32>
    %32 = arith.addf %11, %31 : vector<2x4x128xf32>
    %33 = vector.broadcast %15 : vector<2x1x128xf32> to vector<2x4x128xf32>
    %34 = vector.broadcast %24 : vector<1x4x128xf32> to vector<2x4x128xf32>
    %35 = arith.mulf %33, %34 : vector<2x4x128xf32>
    %36 = arith.addf %12, %35 : vector<2x4x128xf32>
    %37 = vector.extract_strided_slice %1 {offsets = [0, 1, 0], sizes = [2, 1, 128], strides = [1, 1, 1]} : vector<2x4x128xf32> to vector<2x1x128xf32>
    %38 = vector.extract_strided_slice %3 {offsets = [0, 1, 0], sizes = [2, 1, 128], strides = [1, 1, 1]} : vector<2x4x128xf32> to vector<2x1x128xf32>
    %39 = vector.extract_strided_slice %8 {offsets = [0, 1, 0], sizes = [2, 1, 128], strides = [1, 1, 1]} : vector<2x4x128xf32> to vector<2x1x128xf32>
    %40 = vector.extract_strided_slice %5 {offsets = [1, 0, 0], sizes = [1, 4, 128], strides = [1, 1, 1]} : vector<4x4x128xf32> to vector<1x4x128xf32>
    %41 = vector.shape_cast %40 : vector<1x4x128xf32> to vector<4x128xf32>
    %42 = vector.shape_cast %41 : vector<4x128xf32> to vector<1x4x128xf32>
    %43 = vector.extract_strided_slice %7 {offsets = [1, 0, 0], sizes = [1, 4, 128], strides = [1, 1, 1]} : vector<4x4x128xf32> to vector<1x4x128xf32>
    %44 = vector.shape_cast %43 : vector<1x4x128xf32> to vector<4x128xf32>
    %45 = vector.shape_cast %44 : vector<4x128xf32> to vector<1x4x128xf32>
    %46 = vector.extract_strided_slice %9 {offsets = [1, 0, 0], sizes = [1, 4, 128], strides = [1, 1, 1]} : vector<4x4x128xf32> to vector<1x4x128xf32>
    %47 = vector.shape_cast %46 : vector<1x4x128xf32> to vector<4x128xf32>
    %48 = vector.shape_cast %47 : vector<4x128xf32> to vector<1x4x128xf32>
    %49 = vector.broadcast %37 : vector<2x1x128xf32> to vector<2x4x128xf32>
    %50 = vector.broadcast %42 : vector<1x4x128xf32> to vector<2x4x128xf32>
    %51 = arith.mulf %49, %50 : vector<2x4x128xf32>
    %52 = arith.addf %28, %51 : vector<2x4x128xf32>
    %53 = vector.broadcast %38 : vector<2x1x128xf32> to vector<2x4x128xf32>
    %54 = vector.broadcast %45 : vector<1x4x128xf32> to vector<2x4x128xf32>
    %55 = arith.mulf %53, %54 : vector<2x4x128xf32>
    %56 = arith.addf %32, %55 : vector<2x4x128xf32>
    %57 = vector.broadcast %39 : vector<2x1x128xf32> to vector<2x4x128xf32>
    %58 = vector.broadcast %48 : vector<1x4x128xf32> to vector<2x4x128xf32>
    %59 = arith.mulf %57, %58 : vector<2x4x128xf32>
    %60 = arith.addf %36, %59 : vector<2x4x128xf32>
    %61 = vector.extract_strided_slice %1 {offsets = [0, 2, 0], sizes = [2, 1, 128], strides = [1, 1, 1]} : vector<2x4x128xf32> to vector<2x1x128xf32>
    %62 = vector.extract_strided_slice %3 {offsets = [0, 2, 0], sizes = [2, 1, 128], strides = [1, 1, 1]} : vector<2x4x128xf32> to vector<2x1x128xf32>
    %63 = vector.extract_strided_slice %8 {offsets = [0, 2, 0], sizes = [2, 1, 128], strides = [1, 1, 1]} : vector<2x4x128xf32> to vector<2x1x128xf32>
    %64 = vector.extract_strided_slice %5 {offsets = [2, 0, 0], sizes = [1, 4, 128], strides = [1, 1, 1]} : vector<4x4x128xf32> to vector<1x4x128xf32>
    %65 = vector.shape_cast %64 : vector<1x4x128xf32> to vector<4x128xf32>
    %66 = vector.shape_cast %65 : vector<4x128xf32> to vector<1x4x128xf32>
    %67 = vector.extract_strided_slice %7 {offsets = [2, 0, 0], sizes = [1, 4, 128], strides = [1, 1, 1]} : vector<4x4x128xf32> to vector<1x4x128xf32>
    %68 = vector.shape_cast %67 : vector<1x4x128xf32> to vector<4x128xf32>
    %69 = vector.shape_cast %68 : vector<4x128xf32> to vector<1x4x128xf32>
    %70 = vector.extract_strided_slice %9 {offsets = [2, 0, 0], sizes = [1, 4, 128], strides = [1, 1, 1]} : vector<4x4x128xf32> to vector<1x4x128xf32>
    %71 = vector.shape_cast %70 : vector<1x4x128xf32> to vector<4x128xf32>
    %72 = vector.shape_cast %71 : vector<4x128xf32> to vector<1x4x128xf32>
    %73 = vector.broadcast %61 : vector<2x1x128xf32> to vector<2x4x128xf32>
    %74 = vector.broadcast %66 : vector<1x4x128xf32> to vector<2x4x128xf32>
    %75 = arith.mulf %73, %74 : vector<2x4x128xf32>
    %76 = arith.addf %52, %75 : vector<2x4x128xf32>
    %77 = vector.broadcast %62 : vector<2x1x128xf32> to vector<2x4x128xf32>
    %78 = vector.broadcast %69 : vector<1x4x128xf32> to vector<2x4x128xf32>
    %79 = arith.mulf %77, %78 : vector<2x4x128xf32>
    %80 = arith.addf %56, %79 : vector<2x4x128xf32>
    %81 = vector.broadcast %63 : vector<2x1x128xf32> to vector<2x4x128xf32>
    %82 = vector.broadcast %72 : vector<1x4x128xf32> to vector<2x4x128xf32>
    %83 = arith.mulf %81, %82 : vector<2x4x128xf32>
    %84 = arith.addf %60, %83 : vector<2x4x128xf32>
    %85 = vector.extract_strided_slice %1 {offsets = [0, 3, 0], sizes = [2, 1, 128], strides = [1, 1, 1]} : vector<2x4x128xf32> to vector<2x1x128xf32>
    %86 = vector.extract_strided_slice %3 {offsets = [0, 3, 0], sizes = [2, 1, 128], strides = [1, 1, 1]} : vector<2x4x128xf32> to vector<2x1x128xf32>
    %87 = vector.extract_strided_slice %8 {offsets = [0, 3, 0], sizes = [2, 1, 128], strides = [1, 1, 1]} : vector<2x4x128xf32> to vector<2x1x128xf32>
    %88 = vector.extract_strided_slice %5 {offsets = [3, 0, 0], sizes = [1, 4, 128], strides = [1, 1, 1]} : vector<4x4x128xf32> to vector<1x4x128xf32>
    %89 = vector.shape_cast %88 : vector<1x4x128xf32> to vector<4x128xf32>
    %90 = vector.shape_cast %89 : vector<4x128xf32> to vector<1x4x128xf32>
    %91 = vector.extract_strided_slice %7 {offsets = [3, 0, 0], sizes = [1, 4, 128], strides = [1, 1, 1]} : vector<4x4x128xf32> to vector<1x4x128xf32>
    %92 = vector.shape_cast %91 : vector<1x4x128xf32> to vector<4x128xf32>
    %93 = vector.shape_cast %92 : vector<4x128xf32> to vector<1x4x128xf32>
    %94 = vector.extract_strided_slice %9 {offsets = [3, 0, 0], sizes = [1, 4, 128], strides = [1, 1, 1]} : vector<4x4x128xf32> to vector<1x4x128xf32>
    %95 = vector.shape_cast %94 : vector<1x4x128xf32> to vector<4x128xf32>
    %96 = vector.shape_cast %95 : vector<4x128xf32> to vector<1x4x128xf32>
    %97 = vector.broadcast %85 : vector<2x1x128xf32> to vector<2x4x128xf32>
    %98 = vector.broadcast %90 : vector<1x4x128xf32> to vector<2x4x128xf32>
    %99 = arith.mulf %97, %98 : vector<2x4x128xf32>
    %100 = arith.addf %76, %99 : vector<2x4x128xf32>
    %101 = vector.broadcast %86 : vector<2x1x128xf32> to vector<2x4x128xf32>
    %102 = vector.broadcast %93 : vector<1x4x128xf32> to vector<2x4x128xf32>
    %103 = arith.mulf %101, %102 : vector<2x4x128xf32>
    %104 = arith.addf %80, %103 : vector<2x4x128xf32>
    %105 = vector.broadcast %87 : vector<2x1x128xf32> to vector<2x4x128xf32>
    %106 = vector.broadcast %96 : vector<1x4x128xf32> to vector<2x4x128xf32>
    %107 = arith.mulf %105, %106 : vector<2x4x128xf32>
    %108 = arith.addf %84, %107 : vector<2x4x128xf32>
    %109 = arith.subf %100, %104 : vector<2x4x128xf32>
    %c0_16 = arith.constant 0 : index
    %c0_17 = arith.constant 0 : index
    %c0_18 = arith.constant 0 : index
    %c0_19 = arith.constant 0 : index
    %110 = vector.load %arg3[%c0_16, %c0_17, %c0_18, %c0_19] : memref<2x2x4x128xf32, #tpu.memory_space<vmem>>, vector<1x2x4x128xf32>
    %111 = vector.shape_cast %110 : vector<1x2x4x128xf32> to vector<2x4x128xf32>
    %112 = vector.shape_cast %109 : vector<2x4x128xf32> to vector<1x2x4x128xf32>
    tpu.vector_store %arg3[%c0_16, %c0_17, %c0_18, %c0_19], %112 {strides = array<i32>} : memref<2x2x4x128xf32, #tpu.memory_space<vmem>>, vector<1x2x4x128xf32>,
    %113 = arith.subf %108, %100 : vector<2x4x128xf32>
    %114 = arith.subf %113, %104 : vector<2x4x128xf32>
    %c1_20 = arith.constant 1 : index
    %c0_21 = arith.constant 0 : index
    %c0_22 = arith.constant 0 : index
    %c0_23 = arith.constant 0 : index
    %115 = vector.load %arg3[%c1_20, %c0_21, %c0_22, %c0_23] : memref<2x2x4x128xf32, #tpu.memory_space<vmem>>, vector<1x2x4x128xf32>
    %116 = vector.shape_cast %115 : vector<1x2x4x128xf32> to vector<2x4x128xf32>
    %117 = vector.shape_cast %114 : vector<2x4x128xf32> to vector<1x2x4x128xf32>
    tpu.vector_store %arg3[%c1_20, %c0_21, %c0_22, %c0_23], %117 {strides = array<i32>} : memref<2x2x4x128xf32, #tpu.memory_space<vmem>>, vector<1x2x4x128xf32>,
    return
  }
  func.func @transform_0(%arg0: i32) -> (i32, i32, i32, i32) {
    %c0_i32 = arith.constant 0 : i32
    %c0_i32_0 = arith.constant 0 : i32
    %c0_i32_1 = arith.constant 0 : i32
    %c0_i32_2 = arith.constant 0 : i32
    return %c0_i32, %c0_i32_0, %c0_i32_1, %arg0 : i32, i32, i32, i32
  }
  func.func @transform_1(%arg0: i32) -> (i32, i32, i32, i32) {
    %c0_i32 = arith.constant 0 : i32
    %c0_i32_0 = arith.constant 0 : i32
    %c0_i32_1 = arith.constant 0 : i32
    %c0_i32_2 = arith.constant 0 : i32
    return %c0_i32, %c0_i32_0, %c0_i32_1, %arg0 : i32, i32, i32, i32
  }
  func.func @transform_2(%arg0: i32) -> (i32, i32, i32, i32) {
    %c0_i32 = arith.constant 0 : i32
    %c0_i32_0 = arith.constant 0 : i32
    %c0_i32_1 = arith.constant 0 : i32
    %c0_i32_2 = arith.constant 0 : i32
    return %c0_i32, %c0_i32_0, %c0_i32_1, %arg0 : i32, i32, i32, i32
  }
}

</mosaic_0001>

<bundles_post_ra>
// kernel: reverse.1
= control target key start
LH: loop header
LB: loop body
LE: loop exit
PB: predicated region body
PF: predicated region fallthrough
CT: control target
= control target key end

     0   :  { %v71_v3 = vlaneseq  ;;  %v64_v9 = vld [vmem:[#allocation0 + $0x7] ss:$-1 sm:$0xff]  ;;  %v78_v12 = vld [vmem:[#allocation0 + $0x17] ss:$-1 sm:$0xff]  ;;  %s329_s0 = inlined_call_operand.vmem [shape: f32[2,4,16,7], index: 0, kind: input, shape index: {}]   ;;  %s330_s1 = inlined_call_operand.vmem [shape: f32[2,4,16,7], index: 1, kind: output, shape index: {}]  }
   0x1   :  { %v44_v0 = vld [vmem:[%s329_s0] sm:$0xff]  ;;  %v46_v1 = vld [vmem:[%s329_s0 + $0x8] sm:$0xff]  ;;  %v48_v2 = vld [vmem:[%s329_s0 + $0x10] sm:$0xff]  ;;  %v65_v10 = vrot.slane %v64_v9, 1  ;;  %v79_v14 = vrot.slane %v78_v12, 1 }
   0x2   :  { %45 = vst [vmem:[#allocation0 + $0x8] sm:$0xff] %v44_v0  ;;  %47 = vst [vmem:[#allocation0 + $0x18] sm:$0xff] %v46_v1  ;;  %v50_v4 = vld [vmem:[%s329_s0 + $0x18] sm:$0xff]  ;;  %v52_v5 = vld [vmem:[%s329_s0 + $0x20] sm:$0xff]  ;;  %v72_v11 = vshrl.u32 %v71_v3, 7 }
   0x3   :  { %49 = vst [vmem:[#allocation0 + $0x28] sm:$0xff] %v48_v2  ;;  %v54_v6 = vld [vmem:[%s329_s0 + $0x28] sm:$0xff]  ;;  %51 = vst [vmem:[#allocation0 + $0x38] sm:$0xff] %v50_v4  ;;  %v56_v7 = vld [vmem:[%s329_s0 + $0x30] sm:$0xff] }
   0x4   :  { %53 = vst [vmem:[#allocation0 + $0x48] sm:$0xff] %v52_v5  ;;  %55 = vst [vmem:[#allocation0 + $0x58] sm:$0xff] %v54_v6  ;;  %v58_v8 = vld [vmem:[%s329_s0 + $0x38] sm:$0xff]  ;;  %v92_v13 = vld [vmem:[#allocation0 + $0x27] ss:$-1 sm:$0xff]  ;;  %vm73_vm0 = vcmp.lt.s32.totalorder %v72_v11, 7 }
   0x5   :  { %57 = vst [vmem:[#allocation0 + $0x68] sm:$0xff] %v56_v7  ;;  %59 = vst [vmem:[#allocation0 + $0x78] sm:$0xff] %v58_v8  ;;  %v93_v15 = vrot.slane %v92_v13, 1  ;;  %v106_v16 = vld [vmem:[#allocation0 + $0x37] ss:$-1 sm:$0xff] }
   0x6   :  { %66 = vst [vmem:[#allocation1] sm:$0xff] %v65_v10  ;;  %v107_v17 = vrot.slane %v106_v16, 1  ;;  %v120_v18 = vld [vmem:[#allocation0 + $0x47] ss:$-1 sm:$0xff]  ;;  %v134_v19 = vld [vmem:[#allocation0 + $0x57] ss:$-1 sm:$0xff] }
   0x7   :  { %80 = vst [vmem:[#allocation1 + $0x8] sm:$0xff] %v79_v14  ;;  %94 = vst [vmem:[#allocation1 + $0x10] sm:$0xff] %v93_v15  ;;  %v121_v20 = vrot.slane %v120_v18, 1  ;;  %v135_v21 = vrot.slane %v134_v19, 1  ;;  %v148_v22 = vld [vmem:[#allocation0 + $0x67] ss:$-1 sm:$0xff] }
   0x8   :  { %v162_v23 = vld [vmem:[#allocation0 + $0x77] ss:$-1 sm:$0xff]  ;;  %108 = vst [vmem:[#allocation1 + $0x18] sm:$0xff] %v107_v17  ;;  %v149_v24 = vrot.slane %v148_v22, 1 }
   0x9   :  { %v163_v25 = vrot.slane %v162_v23, 1  ;;  %v69_v26 = vld [vmem:[#allocation0 + $0xf] ss:$-1 sm:$0xff]  ;;  %v83_v27 = vld [vmem:[#allocation0 + $0x1f] ss:$-1 sm:$0xff]  ;;  %122 = vst [vmem:[#allocation1 + $0x20] sm:$0xff] %v121_v20 }
   0xa   :  { %v97_v28 = vld [vmem:[#allocation0 + $0x2f] ss:$-1 sm:$0xff]  ;;  %136 = vst [vmem:[#allocation1 + $0x28] sm:$0xff] %v135_v21  ;;  %v70_v29 = vrot.slane %v69_v26, 1  ;;  %v84_v30 = vrot.slane %v83_v27, 1  ;;  %150 = vst [vmem:[#allocation1 + $0x30] sm:$0xff] %v149_v24 }
   0xb   :  { %v98_v31 = vrot.slane %v97_v28, 1  ;;  %v111_v32 = vld [vmem:[#allocation0 + $0x3f] ss:$-1 sm:$0xff]  ;;  %164 = vst [vmem:[#allocation1 + $0x38] sm:$0xff] %v163_v25  ;;  %v125_v34 = vld [vmem:[#allocation0 + $0x4f] ss:$-1 sm:$0xff] }
   0xc   :  { %v112_v33 = vrot.slane %v111_v32, 1  ;;  %v139_v35 = vld [vmem:[#allocation0 + $0x5f] ss:$-1 sm:$0xff]  ;;  %74 = vst.msk [vmem:[#allocation1] sm:$0xff] %vm73_vm0, %v70_v29  ;;  %88 = vst.msk [vmem:[#allocation1 + $0x8] sm:$0xff] %vm73_vm0, %v84_v30  ;;  %v126_v36 = vrot.slane %v125_v34, 1 }
   0xd   :  { %102 = vst.msk [vmem:[#allocation1 + $0x10] sm:$0xff] %vm73_vm0, %v98_v31  ;;  %v140_v37 = vrot.slane %v139_v35, 1  ;;  %v153_v38 = vld [vmem:[#allocation0 + $0x6f] ss:$-1 sm:$0xff]  ;;  %v167_v39 = vld [vmem:[#allocation0 + $0x7f] ss:$-1 sm:$0xff] }
   0xe   :  { %116 = vst.msk [vmem:[#allocation1 + $0x18] sm:$0xff] %vm73_vm0, %v112_v33  ;;  %v154_v40 = vrot.slane %v153_v38, 1  ;;  %v168_v41 = vrot.slane %v167_v39, 1  ;;  %130 = vst.msk [vmem:[#allocation1 + $0x20] sm:$0xff] %vm73_vm0, %v126_v36 }
   0xf   :  { %144 = vst.msk [vmem:[#allocation1 + $0x28] sm:$0xff] %vm73_vm0, %v140_v37 }
  0x10   :  { %158 = vst.msk [vmem:[#allocation1 + $0x30] sm:$0xff] %vm73_vm0, %v154_v40  ;;  %172 = vst.msk [vmem:[#allocation1 + $0x38] sm:$0xff] %vm73_vm0, %v168_v41 }
  0x13   :  { %v214_v42 = vld [vmem:[#allocation1] sm:$0xff]  ;;  %v216_v43 = vld [vmem:[#allocation1 + $0x8] sm:$0xff] }
  0x14   :  { %v218_v44 = vld [vmem:[#allocation1 + $0x10] sm:$0xff]  ;;  %215 = vst [vmem:[%s330_s1] sm:$0xff] %v214_v42  ;;  %217 = vst [vmem:[%s330_s1 + $0x8] sm:$0xff] %v216_v43 }
  0x15   :  { %219 = vst [vmem:[%s330_s1 + $0x10] sm:$0xff] %v218_v44  ;;  %v220_v45 = vld [vmem:[#allocation1 + $0x18] sm:$0xff]  ;;  %v222_v46 = vld [vmem:[#allocation1 + $0x20] sm:$0xff] }
  0x16   :  { %221 = vst [vmem:[%s330_s1 + $0x18] sm:$0xff] %v220_v45  ;;  %v224_v47 = vld [vmem:[#allocation1 + $0x28] sm:$0xff]  ;;  %223 = vst [vmem:[%s330_s1 + $0x20] sm:$0xff] %v222_v46 }
  0x17   :  { %225 = vst [vmem:[%s330_s1 + $0x28] sm:$0xff] %v224_v47  ;;  %v226_v48 = vld [vmem:[#allocation1 + $0x30] sm:$0xff]  ;;  %v228_v49 = vld [vmem:[#allocation1 + $0x38] sm:$0xff] }
  0x18   :  { %227 = vst [vmem:[%s330_s1 + $0x30] sm:$0xff] %v226_v48  ;;  %229 = vst [vmem:[%s330_s1 + $0x38] sm:$0xff] %v228_v49 }

// kernel: a_call__.1
= control target key start
LH: loop header
LB: loop body
LE: loop exit
PB: predicated region body
PF: predicated region fallthrough
CT: control target
= control target key end

     0   :  { %v31_v0 = vlaneseq  ;;  %s321_s0 = inlined_call_operand.vmem [shape: f32[2,2,4,128], index: 0, kind: input, shape index: {}]   ;;  %s322_s1 = inlined_call_operand.vmem [shape: f32[2,4,4,128], index: 1, kind: input, shape index: {}]   ;;  %s323_s2 = inlined_call_operand.vmem [shape: f32[2,2,4,128], index: 2, kind: output, shape index: {}]  }
   0x1   :  { %v11_v1 = vld [vmem:[%s321_s0] sm:$0xf]  ;;  %v190_v2 = vld [vmem:[%s321_s0 + $0x8] sm:$0xf]  ;;  %v17_v4 = vld [vmem:[%s322_s1 + $0x4] sm:$0xf] }
   0x2   :  { %v16_v3 = vld [vmem:[%s322_s1] sm:$0xf]  ;;  %v18_v5 = vld [vmem:[%s322_s1 + $0x8] sm:$0xf]  ;;  %v19_v6 = vld [vmem:[%s322_s1 + $0xc] sm:$0xf]  ;;  %v249_v14 = vadd.f32 %v190_v2, %v11_v1 }
   0x3   :  { %v192_v7 = vld [vmem:[%s322_s1 + $0x10] sm:$0xf]  ;;  %v193_v8 = vld [vmem:[%s322_s1 + $0x14] sm:$0xf]  ;;  %v194_v9 = vld [vmem:[%s322_s1 + $0x18] sm:$0xf] }
   0x4   :  { %v195_v10 = vld [vmem:[%s322_s1 + $0x1c] sm:$0xf]  ;;  %v32_v11 = vshrl.u32 %v31_v0, 7  ;;  %v12_v12 = vld [vmem:[%s321_s0 + $0x4] sm:$0xf]  ;;  %v251_v15 = vadd.f32 %v192_v7, %v16_v3  ;;  %v261_v20 = vadd.f32 %v193_v8, %v17_v4  ;;  %v263_v21 = vadd.f32 %v194_v9, %v18_v5 }
   0x5   :  { %v191_v13 = vld [vmem:[%s321_s0 + $0xc] sm:$0xf]  ;;  %v265_v22 = vadd.f32 %v195_v10, %v19_v6 }
   0x6   :  { %v253_v16 = vsub.s32 0, %v32_v11  ;;  %v255_v17 = vsub.s32 1, %v32_v11  ;;  %v257_v18 = vsub.s32 2, %v32_v11  ;;  %v259_v19 = vsub.s32 3, %v32_v11 }
   0x7   :  { %v267_v23 = vadd.f32 %v191_v13, %v12_v12 }
   0x8   :  { %v34_v24 = vrot.slane %v11_v1, %v253_v16  ;;  %v46_v25 = vrot.slane %v190_v2, %v253_v16  ;;  %v70_v26 = vrot.slane %v11_v1, %v255_v17  ;;  %v82_v27 = vrot.slane %v190_v2, %v255_v17 }
   0x9   :  { %v106_v28 = vrot.slane %v11_v1, %v257_v18  ;;  %v118_v29 = vrot.slane %v190_v2, %v257_v18  ;;  %v142_v30 = vrot.slane %v11_v1, %v259_v19  ;;  %v154_v31 = vrot.slane %v190_v2, %v259_v19 }
   0xa   :  { %v39_v32 = vmul.f32 %v34_v24, %v16_v3  ;;  %v51_v33 = vmul.f32 %v192_v7, %v46_v25  ;;  %v75_v34 = vmul.f32 %v70_v26, %v17_v4  ;;  %v87_v35 = vmul.f32 %v193_v8, %v82_v27 }
   0xb   :  { %v111_v36 = vmul.f32 %v106_v28, %v18_v5  ;;  %v123_v37 = vmul.f32 %v194_v9, %v118_v29  ;;  %v147_v38 = vmul.f32 %v142_v30, %v19_v6  ;;  %v159_v39 = vmul.f32 %v195_v10, %v154_v31 }
   0xc   :  { %v77_v40 = vadd.f32 %v75_v34, %v39_v32  ;;  %v89_v41 = vadd.f32 %v87_v35, %v51_v33  ;;  %v38_v42 = vrot.slane %v12_v12, %v253_v16  ;;  %v50_v43 = vrot.slane %v191_v13, %v253_v16 }
   0xd   :  { %v74_v44 = vrot.slane %v12_v12, %v255_v17  ;;  %v86_v45 = vrot.slane %v191_v13, %v255_v17  ;;  %v110_v46 = vrot.slane %v12_v12, %v257_v18  ;;  %v122_v47 = vrot.slane %v191_v13, %v257_v18 }
   0xe   :  { %v113_v48 = vadd.f32 %v111_v36, %v77_v40  ;;  %v125_v49 = vadd.f32 %v123_v37, %v89_v41  ;;  %v40_v50 = vmul.f32 %v38_v42, %v16_v3  ;;  %v52_v51 = vmul.f32 %v192_v7, %v50_v43 }
   0xf   :  { %v76_v52 = vmul.f32 %v74_v44, %v17_v4  ;;  %v88_v53 = vmul.f32 %v193_v8, %v86_v45  ;;  %v112_v54 = vmul.f32 %v110_v46, %v18_v5  ;;  %v124_v55 = vmul.f32 %v194_v9, %v122_v47 }
  0x10   :  { %v149_v56 = vadd.f32 %v147_v38, %v113_v48  ;;  %v161_v57 = vadd.f32 %v159_v39, %v125_v49  ;;  %v146_v58 = vrot.slane %v12_v12, %v259_v19  ;;  %v158_v59 = vrot.slane %v191_v13, %v259_v19 }
  0x11   :  { %v78_v60 = vadd.f32 %v76_v52, %v40_v50  ;;  %v90_v61 = vadd.f32 %v88_v53, %v52_v51  ;;  %v58_v62 = vrot.slane %v249_v14, %v253_v16  ;;  %v94_v63 = vrot.slane %v249_v14, %v255_v17 }
  0x12   :  { %v175_v0 = vsub.f32 %v149_v56, %v161_v57  ;;  %v148_v1 = vmul.f32 %v146_v58, %v19_v6  ;;  %v160_v2 = vmul.f32 %v195_v10, %v158_v59  ;;  %v130_v3 = vrot.slane %v249_v14, %v257_v18 }
  0x13   :  { %v114_v4 = vadd.f32 %v112_v54, %v78_v60  ;;  %v126_v5 = vadd.f32 %v124_v55, %v90_v61  ;;  %v63_v7 = vmul.f32 %v58_v62, %v251_v15  ;;  %v99_v8 = vmul.f32 %v94_v63, %v261_v20 }
  0x14   :  { %177 = vst [vmem:[%s323_s2] sm:$0xf] %v175_v0  ;;  %v135_v9 = vmul.f32 %v130_v3, %v263_v21  ;;  %v166_v11 = vrot.slane %v249_v14, %v259_v19  ;;  %v62_v6 = vrot.slane %v267_v23, %v253_v16  ;;  %v98_v10 = vrot.slane %v267_v23, %v255_v17 }
  0x15   :  { %v150_v12 = vadd.f32 %v148_v1, %v114_v4  ;;  %v162_v13 = vadd.f32 %v160_v2, %v126_v5  ;;  %v101_v24 = vadd.f32 %v99_v8, %v63_v7  ;;  %v134_v25 = vrot.slane %v267_v23, %v257_v18 }
  0x16   :  { %v171_v26 = vmul.f32 %v166_v11, %v265_v22  ;;  %v64_v27 = vmul.f32 %v62_v6, %v251_v15  ;;  %v100_v28 = vmul.f32 %v98_v10, %v261_v20  ;;  %v170_v14 = vrot.slane %v267_v23, %v259_v19 }
  0x17   :  { %v176_v29 = vsub.f32 %v150_v12, %v162_v13  ;;  %v137_v16 = vadd.f32 %v135_v9, %v101_v24  ;;  %v136_v30 = vmul.f32 %v134_v25, %v263_v21 }
  0x18   :  { %v102_v17 = vadd.f32 %v100_v28, %v64_v27  ;;  %v172_v31 = vmul.f32 %v170_v14, %v265_v22 }
  0x19   :  { %178 = vst [vmem:[%s323_s2 + $0x4] sm:$0xf] %v176_v29  ;;  %v173_v18 = vadd.f32 %v171_v26, %v137_v16 }
  0x1a   :  { %v138_v32 = vadd.f32 %v136_v30, %v102_v17 }
  0x1b   :  { %v179_v33 = vsub.f32 %v173_v18, %v149_v56 }
  0x1c   :  { %v174_v15 = vadd.f32 %v172_v31, %v138_v32 }
  0x1d   :  { %v181_v34 = vsub.f32 %v179_v33, %v161_v57 }
  0x1e   :  { %v180_v20 = vsub.f32 %v174_v15, %v150_v12 }
  0x1f   :  { %196 = vst [vmem:[%s323_s2 + $0x8] sm:$0xf] %v181_v34 }
  0x20   :  { %v182_v19 = vsub.f32 %v180_v20, %v162_v13 }
  0x22   :  { %197 = vst [vmem:[%s323_s2 + $0xc] sm:$0xf] %v182_v19 }

</bundles_post_ra>
